<compile_context>
chip_gen: v5e
topology: v5e:2x2
jax: 0.10.0
libtpu: 0.0.40
codegen_flags: <defaults>
</compile_context>

<pallas_src>
import functools

import jax
import jax.numpy as jnp
from jax.experimental import pallas as pl
from jax.experimental.pallas import tpu as pltpu

EPS = 1e-6          # matches F.pairwise_distance default eps
NUM_CORES = 2       # leading "parallel" grid axis (2 TCs on v7x; no-op on v5e/v6e)


def _round_up(x, m):
    return (x + m - 1) // m * m


def _choose_tile_n(n, d, itemsize):
    # Double-buffered inputs: 2 arrays x 2 pipeline buffers x tile_n x d x itemsize.
    # Keep DMA buffers under ~8 MiB so (with in-kernel f32 temporaries) we stay
    # comfortably inside a 32 MiB scoped VMEM limit on all generations.
    budget = 8 * 1024 * 1024
    per_row = 4 * d * itemsize
    tile = budget // max(per_row, 1)
    tile = max(8, min(2048, tile))
    tile = min(tile, _round_up(n, 8))
    return _round_up(tile, 8)


def _contrastive_loss_kernel(o1_ref, o2_ref, label_ref, out_ref, acc_ref, *,
                             margin, n_rows, tile_n, tiles_per_core):
    c = pl.program_id(0)          # core-split axis ("parallel")
    i = pl.program_id(1)          # batch-tile axis ("arbitrary", carried acc)

    @pl.when(i == 0)
    def _():
        acc_ref[...] = jnp.zeros_like(acc_ref)

    o1 = o1_ref[...].astype(jnp.float32)           # (tile_n, D)
    o2 = o2_ref[...].astype(jnp.float32)           # (tile_n, D)
    lab = label_ref[...].astype(jnp.float32)       # (tile_n, 1)

    diff = o1 - o2 + EPS                           # eps added to the difference
    d2_sum = jnp.sum(diff * diff, axis=-1, keepdims=True)   # (tile_n, 1) == d^2
    d = jnp.sqrt(d2_sum)                           # only needed for the hinge
    hinge = jnp.maximum(margin - d, 0.0)           # clamp(margin - d, min=0)
    per_sample = (1.0 - lab) * d2_sum + lab * (hinge * hinge)

    # Mask rows past the real batch: the tail tile and any clamped duplicate
    # tile from the core split contribute exactly zero.
    t = c * tiles_per_core + i                     # global tile index
    row = t * tile_n + jax.lax.broadcasted_iota(jnp.int32, (tile_n, 1), 0)
    per_sample = jnp.where(row < n_rows, per_sample, 0.0)

    acc_ref[...] += jnp.sum(per_sample)

    @pl.when(i == tiles_per_core - 1)
    def _():
        out_ref[0] = acc_ref[...]                  # per-core partial sum


def contrastive_loss(output1, output2, label, margin=2.0, tile_n=None):
    """output1, output2: (N, D); label: (N, 1). Returns scalar f32 loss."""
    n, d = output1.shape
    assert output2.shape == (n, d)
    assert label.shape == (n, 1)

    if tile_n is None:
        tile_n = _choose_tile_n(n, d, jnp.dtype(output1.dtype).itemsize)
    assert tile_n % 8 == 0, "tile_n must be a multiple of 8 (f32 sublane)"

    total_tiles = -(-n // tile_n)                   # ceil div
    tiles_per_core = -(-total_tiles // NUM_CORES)   # ceil div
    last_tile = total_tiles - 1

    def tile_map(c, i):
        # Clamp so the index never runs off the array; the kernel masks the
        # (entirely out-of-range) rows of a clamped duplicate tile.
        t = c * tiles_per_core + i
        return (jnp.minimum(t, last_tile), 0)

    kernel = functools.partial(
        _contrastive_loss_kernel,
        margin=float(margin), n_rows=n, tile_n=tile_n,
        tiles_per_core=tiles_per_core)

    partials = pl.pallas_call(
        kernel,
        out_shape=jax.ShapeDtypeStruct((NUM_CORES, 1, 1), jnp.float32),
        grid_spec=pltpu.PrefetchScalarGridSpec(
            num_scalar_prefetch=0,
            grid=(NUM_CORES, tiles_per_core),
            in_specs=[
                pl.BlockSpec((tile_n, d), tile_map),
                pl.BlockSpec((tile_n, d), tile_map),
                pl.BlockSpec((tile_n, 1), tile_map),
            ],
            out_specs=pl.BlockSpec((1, 1, 1), lambda c, i: (c, 0, 0)),
            scratch_shapes=[pltpu.VMEM((1, 1), jnp.float32)],
        ),
        compiler_params=pltpu.CompilerParams(
            dimension_semantics=("parallel", "arbitrary"),
            vmem_limit_bytes=32 * 1024 * 1024,
        ),
    )(output1, output2, label)

    # Single divide by N at the end (mean over all N samples).
    return jnp.sum(partials) / n


def contrastive_loss_ref(output1, output2, label, margin=2.0):
    # Pure-JAX reference mirroring the PyTorch module.
    diff = output1.astype(jnp.float32) - output2.astype(jnp.float32) + EPS
    d = jnp.sqrt(jnp.sum(diff * diff, axis=-1, keepdims=True))
    lab = label.astype(jnp.float32)
    hinge = jnp.maximum(margin - d, 0.0)
    return jnp.mean((1.0 - lab) * d**2 + lab * hinge**2)


if __name__ == "__main__":
    key = jax.random.PRNGKey(0)
    k1, k2, k3 = jax.random.split(key, 3)

    # Small shapes; N=40 with tile_n=16 exercises multi-tile pipelining,
    # the 2-way core split, and the masked tail (40 = 16 + 16 + 8).
    N, D = 40, 32
    output1 = jax.random.normal(k1, (N, D), dtype=jnp.float32)
    output2 = jax.random.normal(k2, (N, D), dtype=jnp.float32)
    label = jax.random.bernoulli(k3, 0.5, (N, 1)).astype(jnp.float32)

    loss = contrastive_loss(output1, output2, label, margin=2.0, tile_n=16)
    loss = jax.block_until_ready(loss)
    ref = contrastive_loss_ref(output1, output2, label, margin=2.0)
    assert jnp.allclose(loss, ref, rtol=1e-5, atol=1e-5), (loss, ref)

    # bf16 inputs (halved DMA bytes), f32 math inside the kernel.
    o1b = output1.astype(jnp.bfloat16)
    o2b = output2.astype(jnp.bfloat16)
    loss_b = contrastive_loss(o1b, o2b, label, margin=2.0)
    loss_b = jax.block_until_ready(loss_b)
    ref_b = contrastive_loss_ref(o1b, o2b, label, margin=2.0)
    assert jnp.allclose(loss_b, ref_b, rtol=1e-4, atol=1e-4), (loss_b, ref_b)

    print("KERNEL_OK")
</pallas_src>

<mosaic_0001>
module attributes {stable_mosaic.version = 11 : i64} {
  func.func @_contrastive_loss_kernel(%arg0: i32, %arg1: i32, %arg2: memref<16x32xf32, #tpu.memory_space<vmem>>, %arg3: memref<16x32xf32, #tpu.memory_space<vmem>>, %arg4: memref<16x1xf32, #tpu.memory_space<vmem>>, %arg5: memref<1x1x1xf32, #tpu.memory_space<vmem>>, %arg6: memref<1x1xf32, #tpu.memory_space<vmem>>) attributes {dimension_semantics = [#tpu.dimension_semantics<parallel>, #tpu.dimension_semantics<arbitrary>], iteration_bounds = array<i64: 2, 2>, scalar_prefetch = 0 : i64, scratch_operands = 1 : i64, tpu.core_type = #tpu.core_type<tc>, window_params = [{transform_indices = @transform_0, window_bounds = array<i64: 16, 32>}, {transform_indices = @transform_1, window_bounds = array<i64: 16, 32>}, {transform_indices = @transform_2, window_bounds = array<i64: 16, 1>}, {transform_indices = @transform_3, window_bounds = array<i64: 1, 1, 1>}]} {
    %c0_i32 = arith.constant 0 : i32
    %0 = arith.cmpi eq, %arg1, %c0_i32 : i32
    %1 = arith.extui %0 : i1 to i32
    %c0_i32_0 = arith.constant 0 : i32
    %2 = arith.cmpi ne, %1, %c0_i32_0 : i32
    scf.if %2 {
      %cst_17 = arith.constant 0.000000e+00 : f32
      %44 = vector.broadcast %cst_17 : f32 to vector<1x1xf32>
      %c0_18 = arith.constant 0 : index
      %c0_19 = arith.constant 0 : index
      %45 = vector.load %arg6[%c0_18, %c0_19] : memref<1x1xf32, #tpu.memory_space<vmem>>, vector<1x1xf32>
      tpu.vector_store %arg6[%c0_18, %c0_19], %44 {strides = array<i32>} : memref<1x1xf32, #tpu.memory_space<vmem>>, vector<1x1xf32>,
    } else {
    }
    %c0 = arith.constant 0 : index
    %c0_1 = arith.constant 0 : index
    %3 = vector.load %arg2[%c0, %c0_1] : memref<16x32xf32, #tpu.memory_space<vmem>>, vector<16x32xf32>
    %c0_2 = arith.constant 0 : index
    %c0_3 = arith.constant 0 : index
    %4 = vector.load %arg3[%c0_2, %c0_3] : memref<16x32xf32, #tpu.memory_space<vmem>>, vector<16x32xf32>
    %c0_4 = arith.constant 0 : index
    %c0_5 = arith.constant 0 : index
    %5 = vector.load %arg4[%c0_4, %c0_5] : memref<16x1xf32, #tpu.memory_space<vmem>>, vector<16x1xf32>
    %6 = arith.subf %3, %4 : vector<16x32xf32>
    %cst = arith.constant 9.99999997E-7 : f32
    %7 = vector.broadcast %cst : f32 to vector<16x32xf32>
    %8 = arith.addf %6, %7 : vector<16x32xf32>
    %9 = arith.mulf %8, %8 : vector<16x32xf32>
    %cst_6 = arith.constant dense<0.000000e+00> : vector<16xf32>
    %10 = vector.multi_reduction <add>, %9, %cst_6 [1] : vector<16x32xf32> to vector<16xf32>
    %11 = vector.shape_cast %10 : vector<16xf32> to vector<16x1xf32>
    %12 = math.sqrt %11 : vector<16x1xf32>
    %cst_7 = arith.constant 2.000000e+00 : f32
    %13 = vector.broadcast %cst_7 : f32 to vector<16x1xf32>
    %14 = arith.subf %13, %12 : vector<16x1xf32>
    %cst_8 = arith.constant 0.000000e+00 : f32
    %15 = vector.broadcast %cst_8 : f32 to vector<16x1xf32>
    %16 = arith.maximumf %14, %15 : vector<16x1xf32>
    %cst_9 = arith.constant 1.000000e+00 : f32
    %17 = vector.broadcast %cst_9 : f32 to vector<16x1xf32>
    %18 = arith.subf %17, %5 : vector<16x1xf32>
    %19 = arith.mulf %18, %11 : vector<16x1xf32>
    %20 = arith.mulf %16, %16 : vector<16x1xf32>
    %21 = arith.mulf %5, %20 : vector<16x1xf32>
    %22 = arith.addf %19, %21 : vector<16x1xf32>
    %c2_i32 = arith.constant 2 : i32
    %23 = arith.muli %arg0, %c2_i32 : i32
    %24 = arith.addi %23, %arg1 : i32
    %c16_i32 = arith.constant 16 : i32
    %25 = arith.muli %24, %c16_i32 : i32
    %26 = tpu.iota {dimensions = array<i32: 0>} : vector<16x1xi32>
    %27 = vector.broadcast %25 : i32 to vector<16x1xi32>
    %28 = arith.addi %27, %26 : vector<16x1xi32>
    %c40_i32 = arith.constant 40 : i32
    %29 = vector.broadcast %c40_i32 : i32 to vector<16x1xi32>
    %30 = arith.cmpi slt, %28, %29 : vector<16x1xi32>
    %cst_10 = arith.constant 0.000000e+00 : f32
    %31 = vector.broadcast %cst_10 : f32 to vector<16x1xf32>
    %32 = arith.select %30, %22, %31 : vector<16x1xi1>, vector<16x1xf32>
    %c0_11 = arith.constant 0 : index
    %c0_12 = arith.constant 0 : index
    %33 = vector.load %arg6[%c0_11, %c0_12] : memref<1x1xf32, #tpu.memory_space<vmem>>, vector<1x1xf32>
    %34 = vector.shape_cast %32 : vector<16x1xf32> to vector<1x16x1xf32>
    %cst_13 = arith.constant dense<0.000000e+00> : vector<1xf32>
    %35 = vector.multi_reduction <add>, %34, %cst_13 [1, 2] : vector<1x16x1xf32> to vector<1xf32>
    %36 = vector.shape_cast %35 : vector<1xf32> to vector<1x1x1xf32>
    %37 = vector.extract %36[0, 0, 0] : f32 from vector<1x1x1xf32>
    %38 = vector.broadcast %37 : f32 to vector<1x1xf32>
    %39 = arith.addf %33, %38 : vector<1x1xf32>
    %c0_14 = arith.constant 0 : index
    %c0_15 = arith.constant 0 : index
    %40 = vector.load %arg6[%c0_14, %c0_15] : memref<1x1xf32, #tpu.memory_space<vmem>>, vector<1x1xf32>
    tpu.vector_store %arg6[%c0_14, %c0_15], %39 {strides = array<i32>} : memref<1x1xf32, #tpu.memory_space<vmem>>, vector<1x1xf32>,
    %c1_i32 = arith.constant 1 : i32
    %41 = arith.cmpi eq, %arg1, %c1_i32 : i32
    %42 = arith.extui %41 : i1 to i32
    %c0_i32_16 = arith.constant 0 : i32
    %43 = arith.cmpi ne, %42, %c0_i32_16 : i32
    scf.if %43 {
      %c0_17 = arith.constant 0 : index
      %c0_18 = arith.constant 0 : index
      %44 = vector.load %arg6[%c0_17, %c0_18] : memref<1x1xf32, #tpu.memory_space<vmem>>, vector<1x1xf32>
      %c0_19 = arith.constant 0 : index
      %c0_20 = arith.constant 0 : index
      %c0_21 = arith.constant 0 : index
      %45 = vector.load %arg5[%c0_19, %c0_20, %c0_21] : memref<1x1x1xf32, #tpu.memory_space<vmem>>, vector<1x1x1xf32>
      %46 = vector.shape_cast %45 : vector<1x1x1xf32> to vector<1x1xf32>
      %47 = vector.shape_cast %44 : vector<1x1xf32> to vector<1x1x1xf32>
      tpu.vector_store %arg5[%c0_19, %c0_20, %c0_21], %47 {strides = array<i32>} : memref<1x1x1xf32, #tpu.memory_space<vmem>>, vector<1x1x1xf32>,
    } else {
    }
    return
  }
  func.func @transform_0(%arg0: i32, %arg1: i32) -> (i32, i32) {
    %c2_i32 = arith.constant 2 : i32
    %0 = arith.muli %arg0, %c2_i32 : i32
    %1 = arith.addi %0, %arg1 : i32
    %c2_i32_0 = arith.constant 2 : i32
    %2 = arith.minsi %1, %c2_i32_0 : i32
    %c0_i32 = arith.constant 0 : i32
    %c0_i32_1 = arith.constant 0 : i32
    return %2, %c0_i32 : i32, i32
  }
  func.func @transform_1(%arg0: i32, %arg1: i32) -> (i32, i32) {
    %c2_i32 = arith.constant 2 : i32
    %0 = arith.muli %arg0, %c2_i32 : i32
    %1 = arith.addi %0, %arg1 : i32
    %c2_i32_0 = arith.constant 2 : i32
    %2 = arith.minsi %1, %c2_i32_0 : i32
    %c0_i32 = arith.constant 0 : i32
    %c0_i32_1 = arith.constant 0 : i32
    return %2, %c0_i32 : i32, i32
  }
  func.func @transform_2(%arg0: i32, %arg1: i32) -> (i32, i32) {
    %c2_i32 = arith.constant 2 : i32
    %0 = arith.muli %arg0, %c2_i32 : i32
    %1 = arith.addi %0, %arg1 : i32
    %c2_i32_0 = arith.constant 2 : i32
    %2 = arith.minsi %1, %c2_i32_0 : i32
    %c0_i32 = arith.constant 0 : i32
    %c0_i32_1 = arith.constant 0 : i32
    return %2, %c0_i32 : i32, i32
  }
  func.func @transform_3(%arg0: i32, %arg1: i32) -> (i32, i32, i32) {
    %c0_i32 = arith.constant 0 : i32
    %c0_i32_0 = arith.constant 0 : i32
    %c0_i32_1 = arith.constant 0 : i32
    return %arg0, %c0_i32, %c0_i32_0 : i32, i32, i32
  }
}

</mosaic_0001>

<bundles_post_ra>
// kernel: tpu_custom_call.1
= control target key start
LH: loop header
LB: loop body
LE: loop exit
PB: predicated region body
PF: predicated region fallthrough
CT: control target
= control target key end

     0   :  { %s685_s12 = smov 0   ;;  %s687_s13 = smov 0   ;;  %s764_s0 = inlined_call_operand.vmem [shape: f32[40,32], index: 0, kind: input, shape index: {}]   ;;  %s765_s1 = inlined_call_operand.vmem [shape: f32[40,32], index: 1, kind: input, shape index: {}]   ;;  %s766_s2 = inlined_call_operand.vmem [shape: f32[40,1], index: 2, kind: input, shape index: {}]   ;;  %s767_s3 = inlined_call_operand.vmem [shape: f32[2,1,1], index: 3, kind: output, shape index: {}]  }
   0x1   :  { %s689_s14 = smov 0   ;;  %s691_s15 = smov 0  }
   0x2   :  { %s693_s16 = smov 0  }
   0x3 LB: > { %s22_s17 = sadd.s32 1, %s654_s14  ;;  %s25_s18 = sadd.s32 1, %s658_s15  ;;  %s662_s16 = sphi %s693_s16, %s13_s16   ;;  %s658_s15 = sphi %s691_s15, %s771_s15   ;;  %s654_s14 = sphi %s689_s14, %s770_s14   ;;  %s650_s13 = sphi %s687_s13, %s769_s13   ;;  %s646_s12 = sphi %s685_s12, %s768_s12  }
   0x4   : > { %p23_p0 = scmp.ge.s32.totalorder %s22_s17, 2  ;;  %p561_p1 = scmp.ge.s32.totalorder %s662_s16, 1 }
   0x5   : > { %p244_p2 = scmp.lt.s32.totalorder %s662_s16, 5 }
   0x6   : > { %s773_s17 = smov (%p23_p0, %s22_s17), 0  ;;  %s775_s18 = smov (!%p23_p0, %s25_s18), %s658_s15 }
   0x7   : > { %p245_p3 = pnand %p561_p1, %p244_p2  ;;  %p27_p4 = scmp.ge.s32.totalorder %s775_s18, 2 }
   0x8   : > { %s562_s19 = sshll.u32 (!%p245_p3), %s650_s13, 1  ;;  %p366_p5 = scmp.lt.s32.totalorder (!%p245_p3), %s650_s13, 1 }
   0x9   : > { %s777_s18 = smov (%p27_p4, %s775_s18), 0  ;;  %248 = sbr.rel (%p245_p3) target bundleno = 384 (0x180), region = 32 }
   0xa   : > { %s718_s20 = sadd.s32 (!%p245_p3), %s646_s12, %s562_s19  ;;  %p571_p8 = scmp.ne.s32.totalorder (!%p245_p3), %s646_s12, 0 }
   0xb   : > { %p302_p6 = scmp.lt.s32.totalorder (!%p245_p3), %s718_s20, 2 }
   0xe   : > { %s779_s13 = smov (!%p366_p5, %s650_s13), 1 }
   0xf   : > { %s303_s21 = scalar_select %p302_p6, %s718_s20, 2 }
  0x10   : > { %s368_s24 = scalar_lea.vmem %s767_s3, %s779_s13 }
  0x11   : > { %s563_s25 = sshll.u32 %s303_s21, 1 }
  0x12   : > { %p309_p7 = scmp.lt.s32.totalorder %s563_s25, 4 }
  0x13   : > { %372 = sbr.rel (%p571_p8) target bundleno = 26 (0x1a), region = 36 }
  0x14   : > { %s781_s25 = smov (!%p309_p7, %s563_s25), 4 }
  0x15   : > { %s564_s26 = sshll.u32 %s781_s25, 3 }
  0x16   : > { %s312_s29 = scalar_lea.vmem %s764_s0, %s564_s26  ;;  %s334_s5 = scalar_lea.vmem %s765_s1, %s564_s26 }
  0x17   : > { %s737_s8 = scalar_lea.vmem %s766_s2, %s564_s26 }
  0x18   : > { %vm373_vm0 = vcmask 0   ;;  %v664_v0 = vmov 0.0  }
  0x19   : > { %374 = vst.msk [vmem:[#allocation2] sm:$0x1] %vm373_vm0, %v664_v0 }
  0x1a PF: > { %v375_v1 = vld [vmem:[%s312_s29] sm:$0xff]  ;;  %v376_v3 = vld [vmem:[%s312_s29 + $0x8] sm:$0xff]  ;;  %vm387_vm1 = vcmask 261120   ;;  %v435_v31 = vlaneseq  ;;  %s573_s9 = sshll.u32 %s718_s20, 4  ;;  %vm446_vm8 = vcmask 7168   ;;  %vm461_vm9 = vcmask 0  }
  0x1b   : > { %v377_v2 = vld [vmem:[%s334_s5] sm:$0xff]  ;;  %v378_v5 = vld [vmem:[%s334_s5 + $0x8] sm:$0xff]  ;;  %v438_v41 = vstv %s573_s9  ;;  %p574_p9 = scmp.ne.s32.totalorder %s646_s12, 1 }
  0x1c   : > { %v381_v4 = vsub.f32 %v375_v1, %v377_v2  ;;  %v382_v6 = vsub.f32 %v376_v3, %v378_v5  ;;  %v379_v34 = vld [vmem:[%s737_s8] sm:$0xff]  ;;  %v436_v38 = vshrl.u32 %v435_v31, 7  ;;  %v380_v42 = vld [vmem:[%s737_s8 + $0x8] sm:$0xff] }
  0x1d   : > { %v422_v40 = vsub.f32 1.0, %v379_v34  ;;  %v423_v49 = vsub.f32 1.0, %v380_v42 }
  0x1e   : > { %v383_v7 = vadd.f32 1e-06, %v381_v4  ;;  %v384_v9 = vadd.f32 1e-06, %v382_v6  ;;  %v437_v44 = vadd.s32 8, %v436_v38  ;;  %v439_v47 = vadd.s32 %v438_v41, %v436_v38 }
  0x20   : > { %v385_v8 = vmul.f32 %v383_v7, %v383_v7  ;;  %v386_v11 = vmul.f32 %v384_v9, %v384_v9  ;;  %v440_v51 = vadd.s32 %v438_v41, %v437_v44  ;;  %vm441_vm6 = vcmp.lt.s32.totalorder %v439_v47, 40  ;;  %v445_v5 = vld [vmem:[#allocation2] sm:$0x1] }
  0x22   : > { %v388_v10 = vsel %vm387_vm1, %v385_v8, 0.0  ;;  %v391_v12 = vsel %vm387_vm1, %v386_v11, 0.0  ;;  %vm442_vm7 = vcmp.lt.s32.totalorder %v440_v51, 40 }
  0x23   : > { %389 = vadd.xlane.f32.xlu0 %v388_v10 }
  0x2b   : > { %392 = vadd.xlane.f32.xlu0 %v391_v12 }
  0x96   : > { %v390_v13 = vpop.xlane.xlu0 %389 }
  0x97   : > { %620 = vrsqrt.f32 %v390_v13  ;;  %vm401_vm2 = vcmp.eq.f32.partialorder %v390_v13, inf  ;;  %v404_v25 = vand.u32 2147483648, %v390_v13  ;;  %vm403_vm3 = vcmp.eq.f32.partialorder %v390_v13, 0.0 }
  0x98   : > { %v424_v50 = vmul.f32 %v422_v40, %v390_v13 }
  0x9d   : > { %v621_v14 = vpop.eup %620 }
  0x9e   : > { %v395_v15 = vmul.f32 %v621_v14, %v390_v13  ;;  %v393_v16 = vpop.xlane.xlu0 %392 }
  0x9f   : > { %622 = vrsqrt.f32 %v393_v16  ;;  %vm413_vm4 = vcmp.eq.f32.partialorder %v393_v16, inf  ;;  %v416_v37 = vand.u32 2147483648, %v393_v16  ;;  %vm415_vm5 = vcmp.eq.f32.partialorder %v393_v16, 0.0 }
  0xa0   : > { %v396_v17 = vmul.f32 %v621_v14, %v395_v15  ;;  %v425_v54 = vmul.f32 %v423_v49, %v393_v16 }
  0xa2   : > { %v397_v18 = vmul.f32 0.5, %v396_v17 }
  0xa4   : > { %v398_v19 = vsub.f32 1.5, %v397_v18 }
  0xa5   : > { %v623_v20 = vpop.eup %622 }
  0xa6   : > { %v407_v21 = vmul.f32 %v623_v20, %v393_v16  ;;  %v399_v22 = vmul.f32 %v621_v14, %v398_v19 }
  0xa8   : > { %v408_v23 = vmul.f32 %v623_v20, %v407_v21  ;;  %v400_v24 = vmul.f32 %v399_v22, %v390_v13 }
  0xaa   : > { %v409_v26 = vmul.f32 0.5, %v408_v23  ;;  %v402_v27 = vsel %vm401_vm2, %v390_v13, %v400_v24 }
  0xab   : > { %v405_v28 = vsel %vm403_vm3, %v404_v25, %v402_v27 }
  0xac   : > { %v410_v29 = vsub.f32 1.5, %v409_v26  ;;  %v418_v30 = vsub.f32 2.0, %v405_v28 }
  0xae   : > { %v411_v32 = vmul.f32 %v623_v20, %v410_v29  ;;  %v420_v33 = vmax.f32 %v418_v30, 0.0 }
  0xb0   : > { %v412_v35 = vmul.f32 %v411_v32, %v393_v16  ;;  %v426_v36 = vmul.f32 %v420_v33, %v420_v33 }
  0xb2   : > { %v414_v39 = vsel %vm413_vm4, %v393_v16, %v412_v35  ;;  %v428_v46 = vmul.f32 %v426_v36, %v379_v34 }
  0xb3   : > { %v417_v43 = vsel %vm415_vm5, %v416_v37, %v414_v39 }
  0xb4   : > { %v419_v45 = vsub.f32 2.0, %v417_v43  ;;  %v430_v53 = vadd.f32 %v428_v46, %v424_v50 }
  0xb6   : > { %v421_v48 = vmax.f32 %v419_v45, 0.0  ;;  %v443_v57 = vsel %vm441_vm6, %v430_v53, 0.0 }
  0xb7   : > { %v447_v59 = vsel %vm446_vm8, %v443_v57, 0.0 }
  0xb8   : > { %v427_v52 = vmul.f32 %v421_v48, %v421_v48 }
  0xba   : > { %v429_v55 = vmul.f32 %v427_v52, %v380_v42 }
  0xbc   : > { %v431_v56 = vadd.f32 %v429_v55, %v425_v54 }
  0xbe   : > { %v444_v58 = vsel %vm442_vm7, %v431_v56, 0.0 }
  0xbf   : > { %v448_v60 = vsel %vm446_vm8, %v444_v58, 0.0 }
  0xc0   : > { %v449_v61 = vadd.f32 %v448_v60, %v447_v59 }
  0xc2   : > { %450 = vadd.xlane.f32.xlu1 %v449_v61 }
 0x135   : > { %v451_v62 = vpop.xlane.xlu1 %450 }
 0x136   : > { %v452_v63 = vrot.slane %v451_v62, 4 }
 0x138   : > { %v453_v0 = vadd.f32 %v452_v63, %v451_v62 }
 0x13a   : > { %v454_v1 = vrot.slane %v453_v0, 2 }
 0x13c   : > { %v455_v2 = vadd.f32 %v454_v1, %v453_v0 }
 0x13e   : > { %v456_v3 = vrot.slane %v455_v2, 1 }
 0x140   : > { %v457_v4 = vadd.f32 %v456_v3, %v455_v2 }
 0x142   : > { %577 = vpush %v457_v4 }
 0x173   : > { %s578_s10 = spop %577  ;;  %466 = sbr.rel (%p574_p9) target bundleno = 384 (0x180), region = 40 }
 0x174   : > { %v459_v6 = vstv %s578_s10 }
 0x175   : > { %v460_v7 = vadd.f32 %v459_v6, %v445_v5 }
 0x177   : > { %462 = vst.msk [vmem:[#allocation2] sm:$0x1] %vm461_vm9, %v460_v7 }
 0x17e   : > { %v467_v8 = vld [vmem:[#allocation2] sm:$0x1] }
 0x17f   : > { %468 = vst.msk [vmem:[%s368_s24] sm:$0x1] %vm461_vm9, %v467_v8 }
 0x180 PF: > { %s13_s16 = sadd.s32 1, %s662_s16   ;;  %s768_s12 = smov %s654_s14 }
 0x181   : > { %p10_p10 = scmp.ge.s32.totalorder %s13_s16, 6   ;;  %s769_s13 = smov %s658_s15 }
 0x182   : > { %s770_s14 = smov %s773_s17  ;;  %s771_s15 = smov %s777_s18 }
 0x183   :  { %12 = sbr.rel (!%p10_p10) target bundleno = 3 (0x3), region = 76 }

</bundles_post_ra>
